<compile_context>
chip_gen: v6e
topology: v6e:2x2x1
jax: 0.10.0
libtpu: 0.0.40
codegen_flags: <defaults>
</compile_context>

<pallas_src>
import jax
import jax.numpy as jnp
from jax import lax
from jax.experimental import pallas as pl
from jax.experimental.pallas import tpu as pltpu


def _round_up(x, m):
    return (x + m - 1) // m * m


def _flatten_pad_nchw(x_nchw):
    """(N, C, H, W) -> (N, C, L) with L = round_up(H*W, 128), zero-padded tail."""
    N, C, H, W = x_nchw.shape
    hw = H * W
    L = _round_up(hw, 128)
    x_flat = x_nchw.reshape(N, C, hw)
    if L != hw:
        x_flat = jnp.pad(x_flat, ((0, 0), (0, 0), (0, L - hw)))
    return x_flat, H, W, hw


# ---------------------------------------------------------------------------
# Fused DoubleConv kernel: (valid 3x3 conv + ReLU) x 2, intermediate in VMEM.
# ---------------------------------------------------------------------------
def _make_double_conv_kernel(W):
    def kernel(x_ref, w1_ref, b1_ref, w2_ref, b2_ref, o_ref):
        # x_ref : (1, C_in, L)   f32, channels-major, spatial flattened (L lanes)
        # w1_ref: (9, C_mid, C_in)  bf16, tap-major (kh*3 + kw)
        # b1_ref: (C_mid, 1) f32
        # w2_ref: (9, C_out, C_mid) bf16
        # b2_ref: (C_out, 1) f32
        # o_ref : (1, C_out, L) f32   (valid region: h < H-4, w < W-4)
        L = x_ref.shape[-1]
        c_mid = w1_ref.shape[1]
        c_out = w2_ref.shape[1]

        x = x_ref[0]                                       # (C_in, L) f32
        acc1 = jnp.zeros((c_mid, L), jnp.float32)
        for kh in range(3):
            for kw in range(3):
                d = kh * W + kw
                xs = x if d == 0 else pltpu.roll(x, L - d, axis=1)
                acc1 = acc1 + jnp.dot(
                    w1_ref[kh * 3 + kw], xs.astype(jnp.bfloat16),
                    preferred_element_type=jnp.float32)
        h1 = jnp.maximum(acc1 + b1_ref[...], 0.0)          # f32, stays on-chip

        acc2 = jnp.zeros((c_out, L), jnp.float32)
        for kh in range(3):
            for kw in range(3):
                d = kh * W + kw
                hs = h1 if d == 0 else pltpu.roll(h1, L - d, axis=1)
                acc2 = acc2 + jnp.dot(
                    w2_ref[kh * 3 + kw], hs.astype(jnp.bfloat16),
                    preferred_element_type=jnp.float32)
        o_ref[0] = jnp.maximum(acc2 + b2_ref[...], 0.0)

    return kernel


def _double_conv_pallas(x_flat, w1, b1, w2, b2, W):
    N, c_in, L = x_flat.shape
    c_mid = w1.shape[1]
    c_out = w2.shape[1]
    return pl.pallas_call(
        _make_double_conv_kernel(W),
        out_shape=jax.ShapeDtypeStruct((N, c_out, L), jnp.float32),
        grid_spec=pltpu.PrefetchScalarGridSpec(
            num_scalar_prefetch=0,
            grid=(N,),
            in_specs=[
                pl.BlockSpec((1, c_in, L), lambda n: (n, 0, 0)),
                pl.BlockSpec((9, c_mid, c_in), lambda n: (0, 0, 0)),
                pl.BlockSpec((c_mid, 1), lambda n: (0, 0)),
                pl.BlockSpec((9, c_out, c_mid), lambda n: (0, 0, 0)),
                pl.BlockSpec((c_out, 1), lambda n: (0, 0)),
            ],
            out_specs=pl.BlockSpec((1, c_out, L), lambda n: (n, 0, 0)),
        ),
        compiler_params=pltpu.CompilerParams(
            dimension_semantics=("parallel",)),
    )(x_flat, w1, b1, w2, b2)


# ---------------------------------------------------------------------------
# ConvTranspose2d(kernel=2, stride=2) kernel: 4 tap matmuls, interleave in XLA.
# ---------------------------------------------------------------------------
def _upconv2x2_kernel(x_ref, w_ref, b_ref, o_ref):
    # x_ref: (1, C_in, L) f32; w_ref: (4, C_out, C_in) bf16; b_ref: (C_out, 1)
    # o_ref: (1, 4, C_out, L) f32, tap t = kh*2 + kw
    x = x_ref[0].astype(jnp.bfloat16)
    b = b_ref[...]
    for t in range(4):
        o_ref[0, t] = jnp.dot(w_ref[t], x,
                              preferred_element_type=jnp.float32) + b


def _upconv2x2_pallas(x_flat, w, b):
    N, c_in, L = x_flat.shape
    c_out = w.shape[1]
    return pl.pallas_call(
        _upconv2x2_kernel,
        out_shape=jax.ShapeDtypeStruct((N, 4, c_out, L), jnp.float32),
        grid_spec=pltpu.PrefetchScalarGridSpec(
            num_scalar_prefetch=0,
            grid=(N,),
            in_specs=[
                pl.BlockSpec((1, c_in, L), lambda n: (n, 0, 0)),
                pl.BlockSpec((4, c_out, c_in), lambda n: (0, 0, 0)),
                pl.BlockSpec((c_out, 1), lambda n: (0, 0)),
            ],
            out_specs=pl.BlockSpec((1, 4, c_out, L), lambda n: (n, 0, 0, 0)),
        ),
        compiler_params=pltpu.CompilerParams(
            dimension_semantics=("parallel",)),
    )(x_flat, w, b)


# ---------------------------------------------------------------------------
# Module wrappers (match the PyTorch Decoder / DoubleConv forward semantics).
# ---------------------------------------------------------------------------
class DoubleConvPallas:
    """Conv2d(3x3, valid) -> ReLU -> Conv2d(3x3, valid) -> ReLU, fused."""

    def __init__(self, in_channel, out_channel, key):
        self.in_channel = in_channel
        self.out_channel = out_channel
        k1, k2, k3, k4 = jax.random.split(key, 4)
        # PyTorch-layout f32 parameters (kept for the pure-JAX reference).
        self.w1_oihw = jax.random.normal(
            k1, (out_channel, in_channel, 3, 3), jnp.float32) * 0.1
        self.b1_vec = jax.random.normal(k2, (out_channel,), jnp.float32) * 0.05
        self.w2_oihw = jax.random.normal(
            k3, (out_channel, out_channel, 3, 3), jnp.float32) * 0.1
        self.b2_vec = jax.random.normal(k4, (out_channel,), jnp.float32) * 0.05
        # Kernel layout: tap-major (kh*3+kw, C_out, C_in), bf16 MXU operands.
        self.w1 = jnp.transpose(self.w1_oihw, (2, 3, 0, 1)).reshape(
            9, out_channel, in_channel).astype(jnp.bfloat16)
        self.b1 = self.b1_vec.reshape(out_channel, 1)
        self.w2 = jnp.transpose(self.w2_oihw, (2, 3, 0, 1)).reshape(
            9, out_channel, out_channel).astype(jnp.bfloat16)
        self.b2 = self.b2_vec.reshape(out_channel, 1)

    def __call__(self, x_nchw):
        N = x_nchw.shape[0]
        x_flat, H, W, hw = _flatten_pad_nchw(x_nchw)
        y = _double_conv_pallas(x_flat, self.w1, self.b1, self.w2, self.b2, W)
        y = y[:, :, :hw].reshape(N, self.out_channel, H, W)
        return y[:, :, :H - 4, :W - 4]


class UpConvPallas:
    """ConvTranspose2d(kernel_size=2, stride=2)."""

    def __init__(self, in_channel, out_channel, key):
        self.in_channel = in_channel
        self.out_channel = out_channel
        k1, k2 = jax.random.split(key)
        self.w_iohw = jax.random.normal(
            k1, (in_channel, out_channel, 2, 2), jnp.float32) * 0.1
        self.b_vec = jax.random.normal(k2, (out_channel,), jnp.float32) * 0.05
        self.w = jnp.transpose(self.w_iohw, (2, 3, 1, 0)).reshape(
            4, out_channel, in_channel).astype(jnp.bfloat16)
        self.b = self.b_vec.reshape(out_channel, 1)

    def __call__(self, x_nchw):
        N = x_nchw.shape[0]
        x_flat, H, W, hw = _flatten_pad_nchw(x_nchw)
        y = _upconv2x2_pallas(x_flat, self.w, self.b)       # (N, 4, Cout, L)
        y = y[:, :, :, :hw].reshape(N, 2, 2, self.out_channel, H, W)
        # interleave: out[n, co, 2h+kh, 2w+kw] = y[n, kh, kw, co, h, w]
        y = jnp.transpose(y, (0, 3, 4, 1, 5, 2)).reshape(
            N, self.out_channel, 2 * H, 2 * W)
        return y


def _center_crop_nchw(feature, target_h, target_w):
    h, w = feature.shape[2], feature.shape[3]
    hs = (h - target_h) // 2
    ws = (w - target_w) // 2
    return feature[:, :, hs:hs + target_h, ws:ws + target_w]


class DecoderPallas:
    """Pallas port of the UNET Decoder (upconv -> crop + concat -> DoubleConv)."""

    def __init__(self, out_channel, key):
        self.channels = tuple(out_channel[::-1][:-1])
        n_stage = len(self.channels) - 1
        keys = jax.random.split(key, 2 * max(n_stage, 1))
        self.up_conv = []
        self.dec_conv = []
        for i in range(n_stage):
            self.up_conv.append(
                UpConvPallas(self.channels[i], self.channels[i + 1], keys[2 * i]))
            self.dec_conv.append(
                DoubleConvPallas(self.channels[i], self.channels[i + 1],
                                 keys[2 * i + 1]))

    def __call__(self, x, encfeatures):
        # TODO(synk): the center-crop + channel-concat (pure data movement) and
        # the stride-2 interleave of the transposed conv are done with XLA ops;
        # they could be folded into the DoubleConv pallas_call to remove one
        # more HBM round trip per stage.
        for index, (upconv, conv) in enumerate(zip(self.up_conv, self.dec_conv)):
            x = upconv(x)
            enc = _center_crop_nchw(encfeatures[index], x.shape[2], x.shape[3])
            x = jnp.concatenate([x, enc], axis=1)
            x = conv(x)
        return x


# ---------------------------------------------------------------------------
# Pure-JAX reference (mirrors the bf16-operand / f32-accumulate math).
# ---------------------------------------------------------------------------
def _ref_conv3x3_relu(x_nchw, w_oihw, b_vec):
    y = lax.conv_general_dilated(
        x_nchw.astype(jnp.bfloat16), w_oihw.astype(jnp.bfloat16),
        window_strides=(1, 1), padding="VALID",
        dimension_numbers=("NCHW", "OIHW", "NCHW"),
        preferred_element_type=jnp.float32)
    return jnp.maximum(y + b_vec.reshape(1, -1, 1, 1), 0.0)


def _ref_upconv2x2(x_nchw, w_iohw, b_vec):
    t = jnp.einsum("nchw,cokl->nohkwl",
                   x_nchw.astype(jnp.bfloat16), w_iohw.astype(jnp.bfloat16),
                   preferred_element_type=jnp.float32)
    n, co, h, _, w, _ = t.shape
    return t.reshape(n, co, 2 * h, 2 * w) + b_vec.reshape(1, -1, 1, 1)


def _reference_decoder(x, encfeatures, model):
    for i, (up, dec) in enumerate(zip(model.up_conv, model.dec_conv)):
        x = _ref_upconv2x2(x, up.w_iohw, up.b_vec)
        enc = _center_crop_nchw(encfeatures[i], x.shape[2], x.shape[3])
        x = jnp.concatenate([x, enc], axis=1)
        x = _ref_conv3x3_relu(x, dec.w1_oihw, dec.b1_vec)
        x = _ref_conv3x3_relu(x, dec.w2_oihw, dec.b2_vec)
    return x


if __name__ == "__main__":
    key = jax.random.PRNGKey(0)
    k_param, k_x, k_e0, k_e1 = jax.random.split(key, 4)

    # Small UNET-style decoder: channels = (32, 16, 8) -> two decoder stages.
    out_channel = (4, 8, 16, 32)
    model = DecoderPallas(out_channel, k_param)

    N = 2
    x = jax.random.normal(k_x, (N, 32, 8, 8), jnp.float32)
    encfeatures = [
        jax.random.normal(k_e0, (N, 16, 20, 20), jnp.float32),
        jax.random.normal(k_e1, (N, 8, 28, 28), jnp.float32),
    ]

    out = model(x, encfeatures)
    out = jax.block_until_ready(out)
    assert out.shape == (N, 8, 20, 20), out.shape

    ref = _reference_decoder(x, encfeatures, model)
    ref = jax.block_until_ready(ref)
    assert jnp.allclose(out, ref, atol=2e-2, rtol=2e-2), (
        float(jnp.max(jnp.abs(out - ref))))

    print("KERNEL_OK")
</pallas_src>

<mosaic_0001>
module attributes {stable_mosaic.version = 11 : i64} {
  func.func @_upconv2x2_kernel(%arg0: i32, %arg1: memref<1x32x128xf32, #tpu.memory_space<vmem>>, %arg2: memref<4x16x32xbf16, #tpu.memory_space<vmem>>, %arg3: memref<16x1xf32, #tpu.memory_space<vmem>>, %arg4: memref<1x4x16x128xf32, #tpu.memory_space<vmem>>) attributes {dimension_semantics = [#tpu.dimension_semantics<parallel>], iteration_bounds = array<i64: 2>, scalar_prefetch = 0 : i64, scratch_operands = 0 : i64, tpu.core_type = #tpu.core_type<tc>, window_params = [{transform_indices = @transform_0, window_bounds = array<i64: 1, 32, 128>}, {pipeline_mode = #tpu.pipeline_mode<synchronous>, transform_indices = @transform_1, window_bounds = array<i64: 4, 16, 32>}, {pipeline_mode = #tpu.pipeline_mode<synchronous>, transform_indices = @transform_2, window_bounds = array<i64: 16, 1>}, {transform_indices = @transform_3, window_bounds = array<i64: 1, 4, 16, 128>}]} {
    %c0 = arith.constant 0 : index
    %c0_0 = arith.constant 0 : index
    %c0_1 = arith.constant 0 : index
    %0 = vector.load %arg1[%c0, %c0_0, %c0_1] : memref<1x32x128xf32, #tpu.memory_space<vmem>>, vector<1x32x128xf32>
    %1 = vector.shape_cast %0 : vector<1x32x128xf32> to vector<32x128xf32>
    %2 = arith.truncf %1 : vector<32x128xf32> to vector<32x128xbf16>
    %c0_2 = arith.constant 0 : index
    %c0_3 = arith.constant 0 : index
    %3 = vector.load %arg3[%c0_2, %c0_3] : memref<16x1xf32, #tpu.memory_space<vmem>>, vector<16x1xf32>
    %c0_4 = arith.constant 0 : index
    %c0_5 = arith.constant 0 : index
    %c0_6 = arith.constant 0 : index
    %4 = vector.load %arg2[%c0_4, %c0_5, %c0_6] : memref<4x16x32xbf16, #tpu.memory_space<vmem>>, vector<1x16x32xbf16>
    %5 = vector.shape_cast %4 : vector<1x16x32xbf16> to vector<16x32xbf16>
    %cst = arith.constant dense<0.000000e+00> : vector<16x128xf32>
    %6 = tpu.matmul %5, %2, %cst {dimension_numbers = #tpu.dot_dimension_numbers<[1], [0], [0], [1], [0, 0, 1, 1], [], []>} : vector<16x32xbf16>, vector<32x128xbf16>, vector<16x128xf32> -> vector<16x128xf32>
    %7 = vector.broadcast %3 : vector<16x1xf32> to vector<16x128xf32>
    %8 = arith.addf %6, %7 : vector<16x128xf32>
    %c0_7 = arith.constant 0 : index
    %c0_8 = arith.constant 0 : index
    %c0_9 = arith.constant 0 : index
    %c0_10 = arith.constant 0 : index
    %9 = vector.load %arg4[%c0_7, %c0_8, %c0_9, %c0_10] : memref<1x4x16x128xf32, #tpu.memory_space<vmem>>, vector<1x1x16x128xf32>
    %10 = vector.shape_cast %9 : vector<1x1x16x128xf32> to vector<16x128xf32>
    %11 = vector.shape_cast %8 : vector<16x128xf32> to vector<1x1x16x128xf32>
    tpu.vector_store %arg4[%c0_7, %c0_8, %c0_9, %c0_10], %11 {strides = array<i32>} : memref<1x4x16x128xf32, #tpu.memory_space<vmem>>, vector<1x1x16x128xf32>,
    %c1 = arith.constant 1 : index
    %c0_11 = arith.constant 0 : index
    %c0_12 = arith.constant 0 : index
    %12 = vector.load %arg2[%c1, %c0_11, %c0_12] : memref<4x16x32xbf16, #tpu.memory_space<vmem>>, vector<1x16x32xbf16>
    %13 = vector.shape_cast %12 : vector<1x16x32xbf16> to vector<16x32xbf16>
    %cst_13 = arith.constant dense<0.000000e+00> : vector<16x128xf32>
    %14 = tpu.matmul %13, %2, %cst_13 {dimension_numbers = #tpu.dot_dimension_numbers<[1], [0], [0], [1], [0, 0, 1, 1], [], []>} : vector<16x32xbf16>, vector<32x128xbf16>, vector<16x128xf32> -> vector<16x128xf32>
    %15 = vector.broadcast %3 : vector<16x1xf32> to vector<16x128xf32>
    %16 = arith.addf %14, %15 : vector<16x128xf32>
    %c0_14 = arith.constant 0 : index
    %c1_15 = arith.constant 1 : index
    %c0_16 = arith.constant 0 : index
    %c0_17 = arith.constant 0 : index
    %17 = vector.load %arg4[%c0_14, %c1_15, %c0_16, %c0_17] : memref<1x4x16x128xf32, #tpu.memory_space<vmem>>, vector<1x1x16x128xf32>
    %18 = vector.shape_cast %17 : vector<1x1x16x128xf32> to vector<16x128xf32>
    %19 = vector.shape_cast %16 : vector<16x128xf32> to vector<1x1x16x128xf32>
    tpu.vector_store %arg4[%c0_14, %c1_15, %c0_16, %c0_17], %19 {strides = array<i32>} : memref<1x4x16x128xf32, #tpu.memory_space<vmem>>, vector<1x1x16x128xf32>,
    %c2 = arith.constant 2 : index
    %c0_18 = arith.constant 0 : index
    %c0_19 = arith.constant 0 : index
    %20 = vector.load %arg2[%c2, %c0_18, %c0_19] : memref<4x16x32xbf16, #tpu.memory_space<vmem>>, vector<1x16x32xbf16>
    %21 = vector.shape_cast %20 : vector<1x16x32xbf16> to vector<16x32xbf16>
    %cst_20 = arith.constant dense<0.000000e+00> : vector<16x128xf32>
    %22 = tpu.matmul %21, %2, %cst_20 {dimension_numbers = #tpu.dot_dimension_numbers<[1], [0], [0], [1], [0, 0, 1, 1], [], []>} : vector<16x32xbf16>, vector<32x128xbf16>, vector<16x128xf32> -> vector<16x128xf32>
    %23 = vector.broadcast %3 : vector<16x1xf32> to vector<16x128xf32>
    %24 = arith.addf %22, %23 : vector<16x128xf32>
    %c0_21 = arith.constant 0 : index
    %c2_22 = arith.constant 2 : index
    %c0_23 = arith.constant 0 : index
    %c0_24 = arith.constant 0 : index
    %25 = vector.load %arg4[%c0_21, %c2_22, %c0_23, %c0_24] : memref<1x4x16x128xf32, #tpu.memory_space<vmem>>, vector<1x1x16x128xf32>
    %26 = vector.shape_cast %25 : vector<1x1x16x128xf32> to vector<16x128xf32>
    %27 = vector.shape_cast %24 : vector<16x128xf32> to vector<1x1x16x128xf32>
    tpu.vector_store %arg4[%c0_21, %c2_22, %c0_23, %c0_24], %27 {strides = array<i32>} : memref<1x4x16x128xf32, #tpu.memory_space<vmem>>, vector<1x1x16x128xf32>,
    %c3 = arith.constant 3 : index
    %c0_25 = arith.constant 0 : index
    %c0_26 = arith.constant 0 : index
    %28 = vector.load %arg2[%c3, %c0_25, %c0_26] : memref<4x16x32xbf16, #tpu.memory_space<vmem>>, vector<1x16x32xbf16>
    %29 = vector.shape_cast %28 : vector<1x16x32xbf16> to vector<16x32xbf16>
    %cst_27 = arith.constant dense<0.000000e+00> : vector<16x128xf32>
    %30 = tpu.matmul %29, %2, %cst_27 {dimension_numbers = #tpu.dot_dimension_numbers<[1], [0], [0], [1], [0, 0, 1, 1], [], []>} : vector<16x32xbf16>, vector<32x128xbf16>, vector<16x128xf32> -> vector<16x128xf32>
    %31 = vector.broadcast %3 : vector<16x1xf32> to vector<16x128xf32>
    %32 = arith.addf %30, %31 : vector<16x128xf32>
    %c0_28 = arith.constant 0 : index
    %c3_29 = arith.constant 3 : index
    %c0_30 = arith.constant 0 : index
    %c0_31 = arith.constant 0 : index
    %33 = vector.load %arg4[%c0_28, %c3_29, %c0_30, %c0_31] : memref<1x4x16x128xf32, #tpu.memory_space<vmem>>, vector<1x1x16x128xf32>
    %34 = vector.shape_cast %33 : vector<1x1x16x128xf32> to vector<16x128xf32>
    %35 = vector.shape_cast %32 : vector<16x128xf32> to vector<1x1x16x128xf32>
    tpu.vector_store %arg4[%c0_28, %c3_29, %c0_30, %c0_31], %35 {strides = array<i32>} : memref<1x4x16x128xf32, #tpu.memory_space<vmem>>, vector<1x1x16x128xf32>,
    return
  }
  func.func @transform_0(%arg0: i32) -> (i32, i32, i32) {
    %c0_i32 = arith.constant 0 : i32
    %c0_i32_0 = arith.constant 0 : i32
    %c0_i32_1 = arith.constant 0 : i32
    return %arg0, %c0_i32, %c0_i32_0 : i32, i32, i32
  }
  func.func @transform_1(%arg0: i32) -> (i32, i32, i32) {
    %c0_i32 = arith.constant 0 : i32
    %c0_i32_0 = arith.constant 0 : i32
    %c0_i32_1 = arith.constant 0 : i32
    %c0_i32_2 = arith.constant 0 : i32
    return %c0_i32, %c0_i32_0, %c0_i32_1 : i32, i32, i32
  }
  func.func @transform_2(%arg0: i32) -> (i32, i32) {
    %c0_i32 = arith.constant 0 : i32
    %c0_i32_0 = arith.constant 0 : i32
    %c0_i32_1 = arith.constant 0 : i32
    return %c0_i32, %c0_i32_0 : i32, i32
  }
  func.func @transform_3(%arg0: i32) -> (i32, i32, i32, i32) {
    %c0_i32 = arith.constant 0 : i32
    %c0_i32_0 = arith.constant 0 : i32
    %c0_i32_1 = arith.constant 0 : i32
    %c0_i32_2 = arith.constant 0 : i32
    return %arg0, %c0_i32, %c0_i32_0, %c0_i32_1 : i32, i32, i32, i32
  }
}

</mosaic_0001>

<bundles_post_ra>
// kernel: tpu_custom_call.1
= control target key start
LH: loop header
LB: loop body
LE: loop exit
PB: predicated region body
PF: predicated region fallthrough
CT: control target
= control target key end

     0   :  { %8 = vsyncpa [#allocation3], 0  ;;  %s1034_s0 = inlined_call_operand.hbm [shape: f32[2,32,128], index: 0, kind: input, shape index: {}]   ;;  %s1035_s1 = inlined_call_operand.hbm [shape: bf16[4,16,32], index: 1, kind: input, shape index: {}]   ;;  %s1036_s2 = inlined_call_operand.vmem [shape: f32[16,1], index: 2, kind: input, shape index: {}]   ;;  %s1037_s3 = inlined_call_operand.hbm [shape: f32[2,4,16,128], index: 3, kind: output, shape index: {}]  }
   0x1   :  { %10 = vsyncpa [#allocation3 + $0x1], 0 }
   0x2   :  { %11 = vsyncpa [#allocation6], 0 }
   0x3   :  { %12 = vsyncpa [#allocation4], 0 }
   0x4   :  { %14 = vsyncpa [#allocation4 + $0x1], 0  ;;  %s842_s12 = smov 0   ;;  %s844_s13 = smov 0  }
   0x5   :  { %s846_s14 = smov 0   ;;  %s848_s15 = smov 0  }
   0x6 LB: > { %s863_s16 = sadd.s32 4294967295, %s808_s15   ;;  %s539_s17 = sadd.s32 4294967294, %s808_s15   ;;  %s808_s15 = sphi %s848_s15, %s1059_s15   ;;  %s804_s14 = sphi %s846_s14, %s1058_s14   ;;  %s800_s13 = sphi %s844_s13, %s1057_s13   ;;  %s796_s12 = sphi %s842_s12, %s1056_s12  }
   0x7   : > { %p40_p0 = scmp.ne.s32.totalorder %s800_s13, %s796_s12  ;;  %p1038_p1 = scmp.eq.s32.totalorder %s863_s16, 0 }
   0x8   : > { %p112_p3 = scmp.eq.s32.totalorder %s539_s17, 1  ;;  %p540_p5 = scmp.ge.s32.totalorder %s808_s15, 1 }
   0x9   : > { %p872_p4 = por %p1038_p1, %p40_p0  ;;  %p119_p7 = scmp.lt.s32.totalorder %s808_s15, 3 }
   0xa   : > { %p877_p6 = por %p112_p3, %p40_p0  ;;  %s810_s21 = smov [#allocation5]  }
   0xb   : > { %s1042_s18 = scalar_select %p872_p4, 1, 0 }
   0xc   : > { %s1043_s19 = scalar_select %p877_p6, 1, 0 }
   0xd   : > { %p882_p8 = pnand %p540_p5, %p119_p7  ;;  %s131_s22 = sshll.u32 %s810_s21, 4  ;;  %s132_s22 = int_to_ptr.vmem [resolvable:$true] %s131_s22 }
   0xe   : > { %s896_s24 = sadd.s32 1, %s808_s15   ;;  %s27_s25 = sadd.s32 1, %s804_s14 }
   0xf   : > { %s1044_s20 = scalar_select %p882_p8, 1, 0 }
  0x10   : > { %p623_p9 = pneg %p882_p8  ;;  %s24_s26 = ssub.s32 %s808_s15, %s896_s24 }
  0x11   : > { %s697_s27 = scalar_lea.vmem %s132_s22, 512  ;;  %p705_p5 = scmp.lt.s32.totalorder %s132_s22, %s132_s22 }
  0x12   : > { %p891_p11 = pnand %p623_p9, %p1038_p1  ;;  %p698_p13 = scmp.ne.s32.totalorder %s132_s22, %s697_s27 }
  0x13   : > { %p706_p7 = scmp.lt.s32.totalorder %s697_s27, %s697_s27 }
  0x14   : > { %p688_p12 = pneg %p891_p11 }
  0x15   : > { %p707_p10 = por %p706_p7, %p705_p5 }
  0x16   : > { %p700_p0 = pnand %p698_p13, %p688_p12 }
  0x18   : > { %p701_p3 = pneg %p700_p0 }
  0x1a   : > { %p708_p2 = pnand %p707_p10, %p701_p3 }
  0x1c   : > { %711 = shalt.err (!%p708_p2)
}
  0x1d   : > { %s811_s28 = smov 64   ;;  %s812_s29 = smov 4  }
  0x1e   : > { %626 = dma.hbm_to_vmem [thread:$0]  (!%p891_p11), %s1035_s1, 512, %s132_s22, [#allocation6], %s811_s28, %s811_s28, %s812_s29  }
  0x1f   : > { %p25_p9 = scmp.eq.s32.totalorder %s24_s26, 0  ;;  %p34_p12 = scmp.ne.s32.totalorder %s804_s14, %s800_s13 }
  0x20   : > { %p35_p10 = scmp.eq.s32.totalorder %s808_s15, 0  ;;  %p636_p2 = scmp.lt.s32.totalorder %s808_s15, 2 }
  0x21   : > { %s913_s5 = scalar_select %p25_p9, %s804_s14, %s27_s25  }
  0x22   : > { %p36_p13 = por %p35_p10, %p34_p12  ;;  %p1046_p0 = scmp.eq.s32.totalorder %s863_s16, 1 }
  0x23   : > { %s148_s7 = sand.u32 1, %s804_s14   ;;  %s569_s8 = sshll.u32 %s808_s15, 9 }
  0x24   : > { %p917_p3 = por %p1046_p0, %p34_p12  ;;  %s543_s9 = sshll.u32 %s148_s7, 5 }
  0x25   : > { %s926_s17 = scalar_lea.hbm %s1034_s0, %s569_s8  ;;  %s152_s21 = scalar_lea.vmem [#allocation2], %s543_s9 }
  0x26   : > { %s1047_s6 = scalar_select %p917_p3, 1, 0 }
  0x27   : > { %s159_s22 = sshll.u32 %s152_s21, 4  ;;  %p928_p11 = pnand %p636_p2, %p36_p13  ;;  %s932_s22 = int_to_ptr.vmem [resolvable:$true] %s159_s22 }
  0x28   : > { %s934_s25 = scalar_lea.sflag [#allocation3], %s148_s7  ;;  %s712_s26 = scalar_lea.hbm %s926_s17, 512 }
  0x29   : > { %p713_p5 = scmp.ne.s32.totalorder %s926_s17, %s712_s26  ;;  %p714_p7 = pneg %p928_p11 }
  0x2a   : > { %s717_s29 = scalar_lea.hbm %s1034_s0, 1024  ;;  %p718_p10 = scmp.lt.s32.totalorder %s926_s17, %s1034_s0 }
  0x2b   : > { %p715_p9 = pnand %p714_p7, %p713_p5  ;;  %p719_p2 = scmp.lt.s32.totalorder %s717_s29, %s712_s26 }
  0x2d   : > { %p716_p12 = pneg %p715_p9  ;;  %p720_p13 = por %p719_p2, %p718_p10 }
  0x2f   : > { %p721_p0 = pnand %p720_p13, %p716_p12 }
  0x31   : > { %724 = shalt.err (!%p721_p0)
}
  0x32   : > { %s725_s7 = scalar_lea.vmem %s932_s22, 512  ;;  %s813_s8 = smov [#allocation2]  }
  0x33   : > { %p726_p1 = scmp.ne.s32.totalorder %s932_s22, %s725_s7  ;;  %s730_s9 = sshll.u32 %s813_s8, 4  ;;  %s731_s9 = int_to_ptr.vmem [resolvable:$false] %s730_s9 }
  0x34   : > { %s732_s10 = scalar_lea.vmem %s731_s9, 1024  ;;  %p733_p9 = scmp.lt.s32.totalorder %s932_s22, %s731_s9 }
  0x35   : > { %p728_p6 = pnand %p726_p1, %p714_p7  ;;  %p734_p3 = scmp.lt.s32.totalorder %s732_s10, %s725_s7 }
  0x37   : > { %p729_p5 = pneg %p728_p6  ;;  %p735_p4 = por %p734_p3, %p733_p9 }
  0x39   : > { %p736_p8 = pnand %p735_p4, %p729_p5 }
  0x3b   : > { %739 = shalt.err (!%p736_p8)
}
  0x3c   : > { %s814_s11 = smov 128   ;;  %s815_s21 = smov 8  }
  0x3d   : > { %630 = dma.hbm_to_vmem [thread:$0]  (!%p928_p11), %s926_s17, 512, %s932_s22, %s934_s25, %s814_s11, %s814_s11, %s815_s21  }
  0x3e   : > { %p1049_p1 = scmp.ne.s32.totalorder %s1044_s20, 0 }
  0x3f   : > { %s958_s26 = sand.u32 (!%p1049_p1), 1, %s800_s13   ;;  %p1050_p4 = scmp.ne.s32.totalorder (!%p1049_p1), %s1042_s18, 0 }
  0x40   : > { %171 = sbr.rel (%p1049_p1) target bundleno = 305 (0x131), region = 32  ;;  %s547_s27 = sshll.u32 (!%p1049_p1), %s958_s26, 5 }
  0x41   : > { %s174_s28 = scalar_lea.sflag (!%p1049_p1), [#allocation3], %s958_s26  ;;  %s177_s29 = scalar_lea.vmem (!%p1049_p1), [#allocation2], %s547_s27 }
  0x45   : > { %783 = dma.done.wait (%p1050_p4), %s174_s28, 512  }
  0x46   : > { %785 = vsyncadd (%p1050_p4), %s174_s28, 4294966784  ;;  %p1051_p6 = scmp.eq.s32.totalorder %s863_s16, 0 }
  0x48   : > { %787 = dma.done.wait (%p1051_p6), [#allocation6], 512   ;;  %p1052_p8 = pmov %p1051_p6 }
  0x49   : > { %v816_v0 = vmov 0.0   ;;  %vm817_vm0 = vmmov 0   ;;  %v818_v1 = vmov 0   ;;  %v207_v2 = vld [vmem:[%s177_s29 + $0x10] sm:$0xff]  ;;  %v208_v3 = vld [vmem:[%s177_s29 + $0x18] sm:$0xff]  ;;  %v205_v4 = vld [vmem:[%s177_s29] sm:$0xff] }
  0x4a   : > { %789 = vsyncadd (%p1052_p8), [#allocation6], 4294966784  ;;  %583 = vmatprep.subr.bf16.mxu0 %v816_v0  ;;  %591 = vmatprep.subr.bf16.mxu1 %v816_v0  ;;  %v210_v5 = vpack.c.bf16 %v208_v3, %v207_v2  ;;  %v206_v6 = vld [vmem:[%s177_s29 + $0x8] sm:$0xff]  ;;  %v211_v8 = vld [vmem:[%s1036_s2] sm:$0xff]  ;;  %vm230_vm1 = vcmask 261120   ;;  %s549_s23 = sshll.u32 %s958_s26, 6 }
  0x4b   : > { %587 = vmatprep.mubr.msk.bf16.mxu0 %vm817_vm0, %v816_v0  ;;  %595 = vmatprep.mubr.msk.bf16.mxu1 %vm817_vm0, %v816_v0  ;;  %v209_v7 = vpack.c.bf16 %v206_v6, %v205_v4  ;;  %v682_v9 = vld [vmem:[#allocation5] sm:$0xff]   ;;  %v683_v10 = vld [vmem:[#allocation5 + $0x8] sm:$0xff]   ;;  %v684_v12 = vld [vmem:[#allocation5 + $0x10] sm:$0xff]   ;;  %s203_s25 = scalar_lea.vmem [#allocation7], %s549_s23  ;;  %s570_s4 = sshll.u32 %s863_s16, 10 }
  0x4c   : > { %681 = vset.pattern.permute.xlu0 %v818_v1  ;;  %584 = vmatpush3.bf16.msra.mxu0 %v210_v5  ;;  %v212_v11 = vld [vmem:[%s1036_s2 + $0x8] sm:$0xff]  ;;  %v685_v13 = vld [vmem:[#allocation5 + $0x18] sm:$0xff]   ;;  %s456_s30 = sshll.u32 %s203_s25, 4  ;;  %s991_s9 = scalar_lea.hbm %s1037_s3, %s570_s4  ;;  %s986_s30 = int_to_ptr.vmem [resolvable:$true] %s456_s30 }
  0x4d   : > { %592 = vmatpush3.bf16.msra.mxu1 %v210_v5  ;;  %585 = vmatprep.subr.bf16.mxu0 %v816_v0  ;;  %s443_s16 = scalar_lea.sflag [#allocation4], %s958_s26  ;;  %s740_s10 = scalar_lea.vmem %s986_s30, 1024 }
  0x4e   : > { %593 = vmatprep.subr.bf16.mxu1 %v816_v0  ;;  %217 = vperm.xlu0 %681, %v211_v8   ;;  %p741_p3 = scmp.ne.s32.totalorder %s986_s30, %s740_s10  ;;  %p1053_p11 = scmp.ne.s32.totalorder %s1047_s6, 0 }
  0x4f   : > { %s819_s11 = smov [#allocation7]  }
  0x50   : > { %586 = vmatpush3.bf16.msra.mxu0 %v209_v7  ;;  %p742_p7 = pnand %p741_p3, %p1053_p11  ;;  %s744_s21 = sshll.u32 %s819_s11, 4  ;;  %s745_s21 = int_to_ptr.vmem [resolvable:$false] %s744_s21 }
  0x51   : > { %594 = vmatpush3.bf16.msra.mxu1 %v209_v7  ;;  %599 = vmatprep.subr.bf16.mxu0 %v816_v0  ;;  %s746_s27 = scalar_lea.vmem %s745_s21, 2048  ;;  %p747_p10 = scmp.lt.s32.totalorder %s986_s30, %s745_s21 }
  0x52   : > { %607 = vmatprep.subr.bf16.mxu1 %v816_v0  ;;  %222 = vperm.xlu0 %681, %v212_v11   ;;  %p743_p12 = pneg %p742_p7  ;;  %p748_p2 = scmp.lt.s32.totalorder %s746_s27, %s740_s10 }
  0x53   : > { %588 = vmatmul.mubr.msk.bf16.vlgmr.msra.gmra.mxu0 %vm230_vm1, %v682_v9 }
  0x54   : > { %596 = vmatmul.mubr.msk.bf16.vlgmr.msra.gmra.mxu1 %vm230_vm1, %v683_v10  ;;  %600 = vmatpush3.bf16.msra.mxu0 %v210_v5  ;;  %p749_p13 = por %p748_p2, %p747_p10 }
  0x55   : > { %608 = vmatpush3.bf16.msra.mxu1 %v210_v5  ;;  %601 = vmatprep.subr.bf16.mxu0 %v816_v0 }
  0x56   : > { %609 = vmatprep.subr.bf16.mxu1 %v816_v0  ;;  %603 = vmatprep.mubr.msk.bf16.mxu0 %vm817_vm0, %v816_v0  ;;  %p750_p0 = pnand %p749_p13, %p743_p12 }
  0x57   : > { %611 = vmatprep.mubr.msk.bf16.mxu1 %vm817_vm0, %v816_v0 }
  0x58   : > { %602 = vmatpush3.bf16.msra.mxu0 %v209_v7 }
  0x59   : > { %610 = vmatpush3.bf16.msra.mxu1 %v209_v7 }
  0x5b   : > { %604 = vmatmul.mubr.msk.bf16.vlgmr.msra.gmra.mxu0 %vm230_vm1, %v684_v12 }
  0x5c   : > { %612 = vmatmul.mubr.msk.bf16.vlgmr.msra.gmra.mxu1 %vm230_vm1, %v685_v13 }
  0xc9   : > { %v218_v14 = vpop.permute.xlu0 %217 }
  0xcd   : > { %v223_v19 = vpop.permute.xlu0 %222 }
 0x113   : > { %v268_v15 = vpop.f32.mrf.mxu0 }
 0x114   : > { %v322_v16 = vpop.f32.mrf.mxu1  ;;  %v269_v17 = vadd.f32 %v268_v15, %v218_v14 }
 0x115   : > { %v323_v18 = vadd.f32 %v322_v16, %v218_v14  ;;  %v589_v20 = vpop.f32.mrf.mxu0 }
 0x116   : > { %v597_v21 = vpop.f32.mrf.mxu1  ;;  %275 = vst [vmem:[%s203_s25] sm:$0xff] %v269_v17 }
 0x117   : > { %554 = vst [vmem:[%s203_s25 + $0x10] sm:$0xff] %v323_v18  ;;  %v271_v22 = vpop.f32.mrf.mxu0 }
 0x118   : > { %v325_v23 = vpop.f32.mrf.mxu1  ;;  %v272_v24 = vadd.f32 %v271_v22, %v223_v19 }
 0x119   : > { %v326_v25 = vadd.f32 %v325_v23, %v223_v19  ;;  %v590_v26 = vpop.f32.mrf.mxu0 }
 0x11a   : > { %v598_v27 = vpop.f32.mrf.mxu1  ;;  %276 = vst [vmem:[%s203_s25 + $0x8] sm:$0xff] %v272_v24 }
 0x11b   : > { %555 = vst [vmem:[%s203_s25 + $0x18] sm:$0xff] %v326_v25  ;;  %v377_v28 = vpop.f32.mrf.mxu0 }
 0x11c   : > { %v432_v29 = vpop.f32.mrf.mxu1  ;;  %v378_v30 = vadd.f32 %v377_v28, %v218_v14 }
 0x11d   : > { %v433_v31 = vadd.f32 %v432_v29, %v218_v14  ;;  %v605_v32 = vpop.f32.mrf.mxu0 }
 0x11e   : > { %v613_v33 = vpop.f32.mrf.mxu1  ;;  %558 = vst [vmem:[%s203_s25 + $0x20] sm:$0xff] %v378_v30 }
 0x11f   : > { %562 = vst [vmem:[%s203_s25 + $0x30] sm:$0xff] %v433_v31  ;;  %v380_v34 = vpop.f32.mrf.mxu0 }
 0x120   : > { %v435_v35 = vpop.f32.mrf.mxu1  ;;  %v381_v36 = vadd.f32 %v380_v34, %v223_v19 }
 0x121   : > { %v436_v37 = vadd.f32 %v435_v35, %v223_v19  ;;  %v606_v38 = vpop.f32.mrf.mxu0 }
 0x122   : > { %v614_v39 = vpop.f32.mrf.mxu1  ;;  %559 = vst [vmem:[%s203_s25 + $0x28] sm:$0xff] %v381_v36 }
 0x123   : > { %563 = vst [vmem:[%s203_s25 + $0x38] sm:$0xff] %v436_v37 }
 0x124   : > { %753 = shalt.err (!%p750_p0)
}
 0x125   : > { %s754_s28 = scalar_lea.hbm %s991_s9, 1024  ;;  %s758_s20 = scalar_lea.hbm %s1037_s3, 2048 }
 0x126   : > { %p755_p5 = scmp.ne.s32.totalorder %s991_s9, %s754_s28  ;;  %p759_p4 = scmp.lt.s32.totalorder %s991_s9, %s1037_s3 }
 0x127   : > { %p760_p6 = scmp.lt.s32.totalorder %s758_s20, %s754_s28 }
 0x128   : > { %p756_p9 = pnand %p755_p5, %p1053_p11 }
 0x129   : > { %p761_p8 = por %p760_p6, %p759_p4 }
 0x12a   : > { %p757_p1 = pneg %p756_p9 }
 0x12c   : > { %p762_p3 = pnand %p761_p8, %p757_p1 }
 0x12e   : > { %765 = shalt.err (!%p762_p3)
}
 0x12f   : > { %s820_s23 = smov 128   ;;  %s821_s25 = smov 8  }
 0x130   : > { %621 = dma.vmem_to_hbm [thread:$0]  (%p1053_p11), %s986_s30, 1024, %s991_s9, %s443_s16, %s820_s23, %s820_s23, %s821_s25  }
 0x131 PF: > { %s471_s4 = sand.u32 1, %s796_s12   ;;  %p1054_p7 = scmp.ne.s32.totalorder %s1043_s19, 0 }
 0x132   : > { %p1055_p12 = scmp.ge.s32.totalorder %s808_s15, 2  ;;  %s472_s7 = scalar_lea.sflag [#allocation4], %s471_s4 }
 0x134   : > { %p632_p10 = pnand %p1055_p12, %p1054_p7 }
 0x136   : > { %p633_p2 = pneg %p632_p10 }
 0x138   : > { %791 = dma.done.wait (%p633_p2), %s472_s7, 1024  }
 0x139   : > { %793 = vsyncadd (%p633_p2), %s472_s7, 4294966272  ;;  %p17_p13 = scmp.ge.s32.totalorder %s896_s24, 4   ;;  %s1056_s12 = smov %s800_s13 }
 0x13a   : > { %s1057_s13 = smov %s804_s14  ;;  %s1058_s14 = smov %s913_s5 }
 0x13b   : > { %s1059_s15 = smov %s896_s24  ;;  %19 = sbr.rel (!%p17_p13) target bundleno = 6 (0x6), region = 87 }
 0x140   :  { %477 = vsyncpa [#allocation3], 1 }
 0x141   :  { %479 = vsyncpa [#allocation3 + $0x1], 1 }
 0x142   :  { %480 = vsyncpa [#allocation6], 1 }
 0x143   :  { %481 = vsyncpa [#allocation4], 1 }
 0x144   :  { %483 = vsyncpa [#allocation4 + $0x1], 1 }

</bundles_post_ra>
